<compile_context>
chip_gen: v7x
topology: tpu7x:2x2x1
jax: 0.10.0
libtpu: 0.0.40
codegen_flags: <defaults>
</compile_context>

<pallas_src>
import jax
import jax.numpy as jnp
from jax.experimental import pallas as pl
from jax.experimental.pallas import tpu as pltpu

FEATURE_DIM = 2048
NUM_CLASSES = 2
NUM_CLASSES_PADDED = 128   # lane-dense classifier output width
BATCH_TILE = 8             # sublane-aligned batch tile


def simclr_classifier_kernel(x_ref, w_enc_ref, b_enc_ref, w_cls_ref, b_cls_ref,
                             out_ref):
    # x_ref:     [TB, C, HW]  f32   (NCHW with spatial flattened; HW lane-dense)
    # w_enc_ref: [C, F]       bf16  (1x1-conv weight of the stand-in encoder)
    # b_enc_ref: [1, F]       f32
    # w_cls_ref: [F, NCP]     bf16  (zero-padded to 128 output lanes)
    # b_cls_ref: [1, NCP]     f32
    # out_ref:   [TB, NCP]    f32
    #
    # Pool over spatial dims FIRST (exact algebra: mean is linear and precedes
    # the ReLU), so the encoder matmul is only [TB, C] @ [C, F].
    x_mean = jnp.mean(x_ref[...], axis=-1)                         # [TB, C] f32

    feat = jnp.dot(x_mean.astype(jnp.bfloat16), w_enc_ref[...],
                   preferred_element_type=jnp.float32) + b_enc_ref[...]
    feat = jnp.maximum(feat, 0.0)                                  # [TB, F] f32

    logits = jnp.dot(feat.astype(jnp.bfloat16), w_cls_ref[...],
                     preferred_element_type=jnp.float32) + b_cls_ref[...]
    out_ref[...] = logits.astype(out_ref.dtype)                    # [TB, NCP]


def simclr_classifier(x_nchw, w_enc, b_enc, w_cls, b_cls):
    """x_nchw: [B, C, H, W] float32 -> logits [B, NUM_CLASSES] float32."""
    B, C, H, W = x_nchw.shape
    HW = H * W

    # Free reshape (no transpose): NCHW -> [B, C, H*W].
    x = x_nchw.reshape(B, C, HW)

    # Pad batch to a multiple of the batch tile (rows are sliced off at the end).
    b_pad = pl.cdiv(B, BATCH_TILE) * BATCH_TILE
    if b_pad != B:
        x = jnp.pad(x, ((0, b_pad - B), (0, 0), (0, 0)))

    # bf16 matmul operands; zero-pad classifier weights/bias to 128 lanes.
    w_enc_bf = w_enc.astype(jnp.bfloat16)
    w_cls_p = jnp.zeros((FEATURE_DIM, NUM_CLASSES_PADDED), jnp.bfloat16)
    w_cls_p = w_cls_p.at[:, :NUM_CLASSES].set(w_cls.astype(jnp.bfloat16))
    b_cls_p = jnp.zeros((1, NUM_CLASSES_PADDED), jnp.float32)
    b_cls_p = b_cls_p.at[:, :NUM_CLASSES].set(b_enc.dtype.type(0) + b_cls)

    grid = (b_pad // BATCH_TILE,)
    out = pl.pallas_call(
        simclr_classifier_kernel,
        out_shape=jax.ShapeDtypeStruct((b_pad, NUM_CLASSES_PADDED), jnp.float32),
        grid=grid,
        in_specs=[
            pl.BlockSpec((BATCH_TILE, C, HW), lambda i: (i, 0, 0)),
            pl.BlockSpec((C, FEATURE_DIM), lambda i: (0, 0)),
            pl.BlockSpec((1, FEATURE_DIM), lambda i: (0, 0)),
            pl.BlockSpec((FEATURE_DIM, NUM_CLASSES_PADDED), lambda i: (0, 0)),
            pl.BlockSpec((1, NUM_CLASSES_PADDED), lambda i: (0, 0)),
        ],
        out_specs=pl.BlockSpec((BATCH_TILE, NUM_CLASSES_PADDED),
                               lambda i: (i, 0)),
        compiler_params=pltpu.CompilerParams(
            dimension_semantics=("parallel",),
            vmem_limit_bytes=32 * 1024 * 1024,
        ),
    )(x, w_enc_bf, b_enc, w_cls_p, b_cls_p)

    return out[:B, :NUM_CLASSES]


def reference(x_nchw, w_enc, b_enc, w_cls, b_cls):
    """Pure-JAX f32 reference in the original (un-reordered) op order."""
    B, C, H, W = x_nchw.shape
    x_flat = jnp.transpose(x_nchw, (0, 2, 3, 1)).reshape(B, H * W, C)
    y = jnp.einsum("bhc,cf->bhf", x_flat, w_enc)
    feat = jnp.maximum(jnp.mean(y, axis=1) + b_enc, 0.0)
    return feat @ w_cls + b_cls


if __name__ == "__main__":
    key = jax.random.PRNGKey(0)
    k_x, k_we, k_be, k_wc, k_bc = jax.random.split(key, 5)

    B, C, H, W = 2, 4, 16, 16
    x = jax.random.normal(k_x, (B, C, H, W), dtype=jnp.float32)

    # Deterministic parameter init (synthetic; no checkpoint load).
    w_enc = jax.random.normal(k_we, (C, FEATURE_DIM), dtype=jnp.float32) * 0.05
    b_enc = jax.random.normal(k_be, (1, FEATURE_DIM), dtype=jnp.float32) * 0.05
    w_cls = jax.random.normal(k_wc, (FEATURE_DIM, NUM_CLASSES), dtype=jnp.float32) * 0.02
    b_cls = jax.random.normal(k_bc, (1, NUM_CLASSES), dtype=jnp.float32) * 0.02

    logits = simclr_classifier(x, w_enc, b_enc, w_cls, b_cls)
    logits = jax.block_until_ready(logits)

    ref = reference(x, w_enc, b_enc, w_cls, b_cls)
    assert logits.shape == (B, NUM_CLASSES), logits.shape
    # bf16 matmul operands (f32 accumulation) -> slightly relaxed tolerance.
    assert jnp.allclose(logits, ref, atol=1e-3, rtol=1e-3), (logits, ref)

    print("KERNEL_OK")
</pallas_src>

<mosaic_0001>
module attributes {stable_mosaic.version = 11 : i64} {
  func.func @simclr_classifier_kernel(%arg0: i32, %arg1: memref<8x4x256xf32, #tpu.memory_space<vmem>>, %arg2: memref<4x2048xbf16, #tpu.memory_space<vmem>>, %arg3: memref<1x2048xf32, #tpu.memory_space<vmem>>, %arg4: memref<2048x128xbf16, #tpu.memory_space<vmem>>, %arg5: memref<1x128xf32, #tpu.memory_space<vmem>>, %arg6: memref<8x128xf32, #tpu.memory_space<vmem>>) attributes {dimension_semantics = [#tpu.dimension_semantics<parallel>], iteration_bounds = array<i64: 1>, scalar_prefetch = 0 : i64, scratch_operands = 0 : i64, tpu.core_type = #tpu.core_type<tc>, window_params = [{transform_indices = @transform_0, window_bounds = array<i64: 8, 4, 256>}, {pipeline_mode = #tpu.pipeline_mode<synchronous>, transform_indices = @transform_1, window_bounds = array<i64: 4, 2048>}, {pipeline_mode = #tpu.pipeline_mode<synchronous>, transform_indices = @transform_2, window_bounds = array<i64: 1, 2048>}, {pipeline_mode = #tpu.pipeline_mode<synchronous>, transform_indices = @transform_3, window_bounds = array<i64: 2048, 128>}, {pipeline_mode = #tpu.pipeline_mode<synchronous>, transform_indices = @transform_4, window_bounds = array<i64: 1, 128>}, {transform_indices = @transform_5, window_bounds = array<i64: 8, 128>}]} {
    %c0 = arith.constant 0 : index
    %c0_0 = arith.constant 0 : index
    %c0_1 = arith.constant 0 : index
    %0 = vector.load %arg1[%c0, %c0_0, %c0_1] : memref<8x4x256xf32, #tpu.memory_space<vmem>>, vector<8x4x256xf32>
    %cst = arith.constant dense<0.000000e+00> : vector<8x4xf32>
    %1 = vector.multi_reduction <add>, %0, %cst [2] : vector<8x4x256xf32> to vector<8x4xf32>
    %cst_2 = arith.constant 2.560000e+02 : f32
    %2 = vector.broadcast %cst_2 : f32 to vector<8x4xf32>
    %3 = arith.divf %1, %2 : vector<8x4xf32>
    %4 = arith.truncf %3 : vector<8x4xf32> to vector<8x4xbf16>
    %c0_3 = arith.constant 0 : index
    %c0_4 = arith.constant 0 : index
    %5 = vector.load %arg2[%c0_3, %c0_4] : memref<4x2048xbf16, #tpu.memory_space<vmem>>, vector<4x2048xbf16>
    %cst_5 = arith.constant dense<0.000000e+00> : vector<8x2048xf32>
    %6 = tpu.matmul %4, %5, %cst_5 {dimension_numbers = #tpu.dot_dimension_numbers<[1], [0], [0], [1], [0, 0, 1, 1], [], []>} : vector<8x4xbf16>, vector<4x2048xbf16>, vector<8x2048xf32> -> vector<8x2048xf32>
    %c0_6 = arith.constant 0 : index
    %c0_7 = arith.constant 0 : index
    %7 = vector.load %arg3[%c0_6, %c0_7] : memref<1x2048xf32, #tpu.memory_space<vmem>>, vector<1x2048xf32>
    %8 = vector.broadcast %7 : vector<1x2048xf32> to vector<8x2048xf32>
    %9 = arith.addf %6, %8 : vector<8x2048xf32>
    %cst_8 = arith.constant 0.000000e+00 : f32
    %10 = vector.broadcast %cst_8 : f32 to vector<8x2048xf32>
    %11 = arith.maximumf %9, %10 : vector<8x2048xf32>
    %12 = arith.truncf %11 : vector<8x2048xf32> to vector<8x2048xbf16>
    %c0_9 = arith.constant 0 : index
    %c0_10 = arith.constant 0 : index
    %13 = vector.load %arg4[%c0_9, %c0_10] : memref<2048x128xbf16, #tpu.memory_space<vmem>>, vector<2048x128xbf16>
    %cst_11 = arith.constant dense<0.000000e+00> : vector<8x128xf32>
    %14 = tpu.matmul %12, %13, %cst_11 {dimension_numbers = #tpu.dot_dimension_numbers<[1], [0], [0], [1], [0, 0, 1, 1], [], []>} : vector<8x2048xbf16>, vector<2048x128xbf16>, vector<8x128xf32> -> vector<8x128xf32>
    %c0_12 = arith.constant 0 : index
    %c0_13 = arith.constant 0 : index
    %15 = vector.load %arg5[%c0_12, %c0_13] : memref<1x128xf32, #tpu.memory_space<vmem>>, vector<1x128xf32>
    %16 = vector.broadcast %15 : vector<1x128xf32> to vector<8x128xf32>
    %17 = arith.addf %14, %16 : vector<8x128xf32>
    %c0_14 = arith.constant 0 : index
    %c0_15 = arith.constant 0 : index
    %18 = vector.load %arg6[%c0_14, %c0_15] : memref<8x128xf32, #tpu.memory_space<vmem>>, vector<8x128xf32>
    tpu.vector_store %arg6[%c0_14, %c0_15], %17 {strides = array<i32>} : memref<8x128xf32, #tpu.memory_space<vmem>>, vector<8x128xf32>,
    return
  }
  func.func @transform_0(%arg0: i32) -> (i32, i32, i32) {
    %c0_i32 = arith.constant 0 : i32
    %c0_i32_0 = arith.constant 0 : i32
    %c0_i32_1 = arith.constant 0 : i32
    return %arg0, %c0_i32, %c0_i32_0 : i32, i32, i32
  }
  func.func @transform_1(%arg0: i32) -> (i32, i32) {
    %c0_i32 = arith.constant 0 : i32
    %c0_i32_0 = arith.constant 0 : i32
    %c0_i32_1 = arith.constant 0 : i32
    return %c0_i32, %c0_i32_0 : i32, i32
  }
  func.func @transform_2(%arg0: i32) -> (i32, i32) {
    %c0_i32 = arith.constant 0 : i32
    %c0_i32_0 = arith.constant 0 : i32
    %c0_i32_1 = arith.constant 0 : i32
    return %c0_i32, %c0_i32_0 : i32, i32
  }
  func.func @transform_3(%arg0: i32) -> (i32, i32) {
    %c0_i32 = arith.constant 0 : i32
    %c0_i32_0 = arith.constant 0 : i32
    %c0_i32_1 = arith.constant 0 : i32
    return %c0_i32, %c0_i32_0 : i32, i32
  }
  func.func @transform_4(%arg0: i32) -> (i32, i32) {
    %c0_i32 = arith.constant 0 : i32
    %c0_i32_0 = arith.constant 0 : i32
    %c0_i32_1 = arith.constant 0 : i32
    return %c0_i32, %c0_i32_0 : i32, i32
  }
  func.func @transform_5(%arg0: i32) -> (i32, i32) {
    %c0_i32 = arith.constant 0 : i32
    %c0_i32_0 = arith.constant 0 : i32
    return %arg0, %c0_i32 : i32, i32
  }
}

</mosaic_0001>

<bundles_post_ra>
// kernel: tpu_custom_call.1
= control target key start
LH: loop header
LB: loop body
LE: loop exit
PB: predicated region body
PF: predicated region fallthrough
CT: control target
= control target key end

     0   :  { %10 = vsyncpa [#allocation3], 0  ;;  %s3025_s0 = inlined_call_operand.hbm [shape: f32[8,4,256], index: 0, kind: input, shape index: {}]   ;;  %s3026_s1 = inlined_call_operand.hbm [shape: bf16[4,2048], index: 1, kind: input, shape index: {}]   ;;  %s3027_s2 = inlined_call_operand.hbm [shape: f32[1,2048], index: 2, kind: input, shape index: {}]   ;;  %s3028_s3 = inlined_call_operand.hbm [shape: bf16[2048,128], index: 3, kind: input, shape index: {}]   ;;  %s3029_s4 = inlined_call_operand.vmem [shape: f32[1,128], index: 4, kind: input, shape index: {}]   ;;  %s3030_s5 = inlined_call_operand.hbm [shape: f32[8,128], index: 5, kind: output, shape index: {}]  }
   0x1   :  { %11 = vsyncpa [#allocation6], 0 }
   0x2   :  { %12 = vsyncpa [#allocation9], 0 }
   0x3   :  { %13 = vsyncpa [#allocation4], 0  ;;  %s2760_s18 = smov [#allocation5]   ;;  %s2761_s20 = smov [#allocation2]  }
   0x4   :  { %s32_s19 = sshll.u32 %s2760_s18, 4  ;;  %s19_s21 = sshll.u32 %s2761_s20, 4  ;;  %s33_s19 = int_to_ptr.vmem [resolvable:$true] %s32_s19  ;;  %s2801_s21 = int_to_ptr.vmem [resolvable:$true] %s19_s21 }
   0x5   :  { %s2642_s24 = scalar_lea.hbm %s3026_s1, 512 }
   0x6   :  { %p2643_p0 = scmp.ne.s32.totalorder %s3026_s1, %s2642_s24  ;;  %p2646_p1 = scmp.lt.u32.totalorder %s2642_s24, %s3026_s1 }
   0x8   :  { %p2648_p2 = pnand %p2646_p1, %p2643_p0 }
   0xa   :  { %2651 = shalt.err (!%p2648_p2)
}
   0xb   :  { %s2652_s29 = scalar_lea.vmem %s33_s19, 512  ;;  %p2657_p4 = scmp.lt.s32.totalorder %s33_s19, %s33_s19 }
   0xc   :  { %p2653_p3 = scmp.ne.s32.totalorder %s33_s19, %s2652_s29  ;;  %p2658_p5 = scmp.lt.s32.totalorder %s2652_s29, %s2652_s29 }
   0xe   :  { %p2659_p6 = por %p2658_p5, %p2657_p4 }
  0x10   :  { %p2660_p7 = pnand %p2659_p6, %p2653_p3 }
  0x12   :  { %2663 = shalt.err (!%p2660_p7)
}
  0x13   :  { %35 = dma.hbm_to_vmem [thread:$0]  %s3026_s1, 512, %s33_s19, [#allocation6]  }
  0x14   :  { %s2664_s9 = scalar_lea.hbm %s3025_s0, 1024 }
  0x15   :  { %p2665_p8 = scmp.ne.s32.totalorder %s3025_s0, %s2664_s9  ;;  %p2668_p9 = scmp.lt.u32.totalorder %s2664_s9, %s3025_s0 }
  0x17   :  { %p2670_p10 = pnand %p2668_p9, %p2665_p8 }
  0x19   :  { %2673 = shalt.err (!%p2670_p10)
}
  0x1a   :  { %s2674_s14 = scalar_lea.vmem %s2801_s21, 1024  ;;  %p2679_p12 = scmp.lt.s32.totalorder %s2801_s21, %s2801_s21 }
  0x1b   :  { %p2675_p11 = scmp.ne.s32.totalorder %s2801_s21, %s2674_s14  ;;  %p2680_p13 = scmp.lt.s32.totalorder %s2674_s14, %s2674_s14 }
  0x1d   :  { %p2681_p0 = por %p2680_p13, %p2679_p12 }
  0x1f   :  { %p2682_p1 = pnand %p2681_p0, %p2675_p11 }
  0x21   :  { %2685 = shalt.err (!%p2682_p1)
}
  0x22   :  { %s2762_s1 = smov 128   ;;  %s2763_s15 = smov 8  }
  0x23   :  { %25 = dma.hbm_to_vmem [thread:$0]  %s3025_s0, 1024, %s2801_s21, [#allocation3], %s2762_s1, %s2762_s1, %s2763_s15  }
  0x24   :  { %s2764_s18 = smov [#allocation7]   ;;  %s2765_s20 = smov [#allocation8]  }
  0x25   :  { %s42_s19 = sshll.u32 %s2764_s18, 4  ;;  %s51_s22 = sshll.u32 %s2765_s20, 4  ;;  %s43_s19 = int_to_ptr.vmem [resolvable:$true] %s42_s19  ;;  %s2832_s22 = int_to_ptr.vmem [resolvable:$true] %s51_s22 }
  0x26   :  { %s2686_s25 = scalar_lea.hbm %s3027_s2, 256 }
  0x27   :  { %p2687_p2 = scmp.ne.s32.totalorder %s3027_s2, %s2686_s25  ;;  %p2690_p3 = scmp.lt.u32.totalorder %s2686_s25, %s3027_s2 }
  0x29   :  { %p2692_p4 = pnand %p2690_p3, %p2687_p2 }
  0x2b   :  { %2695 = shalt.err (!%p2692_p4)
}
  0x2c   :  { %s2696_s0 = scalar_lea.vmem %s43_s19, 256  ;;  %p2701_p6 = scmp.lt.s32.totalorder %s43_s19, %s43_s19 }
  0x2d   :  { %p2697_p5 = scmp.ne.s32.totalorder %s43_s19, %s2696_s0  ;;  %p2702_p7 = scmp.lt.s32.totalorder %s2696_s0, %s2696_s0 }
  0x2f   :  { %p2703_p8 = por %p2702_p7, %p2701_p6 }
  0x31   :  { %p2704_p9 = pnand %p2703_p8, %p2697_p5 }
  0x33   :  { %2707 = shalt.err (!%p2704_p9)
}
  0x34   :  { %45 = dma.hbm_to_vmem [thread:$0]  %s3027_s2, 256, %s43_s19, [#allocation6]  }
  0x35   :  { %s2708_s8 = scalar_lea.hbm %s3028_s3, 16384 }
  0x36   :  { %p2709_p10 = scmp.ne.s32.totalorder %s3028_s3, %s2708_s8  ;;  %p2712_p11 = scmp.lt.u32.totalorder %s2708_s8, %s3028_s3 }
  0x38   :  { %p2714_p12 = pnand %p2712_p11, %p2709_p10 }
  0x3a   :  { %2717 = shalt.err (!%p2714_p12)
}
  0x3b   :  { %s2718_s13 = scalar_lea.vmem %s2832_s22, 16384  ;;  %p2723_p0 = scmp.lt.s32.totalorder %s2832_s22, %s2832_s22 }
  0x3c   :  { %p2719_p13 = scmp.ne.s32.totalorder %s2832_s22, %s2718_s13  ;;  %p2724_p1 = scmp.lt.s32.totalorder %s2718_s13, %s2718_s13 }
  0x3e   :  { %p2725_p2 = por %p2724_p1, %p2723_p0 }
  0x40   :  { %p2726_p3 = pnand %p2725_p2, %p2719_p13 }
  0x42   :  { %2729 = shalt.err (!%p2726_p3)
}
  0x43   :  { %s2766_s2 = smov 64   ;;  %s2767_s14 = smov 4  }
  0x44   :  { %57 = dma.hbm_to_vmem [thread:$0]  %s3028_s3, 16384, %s2832_s22, [#allocation9], %s2766_s2, %s2766_s2, %s2767_s14  }
  0x45   :  { %2752 = dma.done.wait [#allocation3], 1024  }
  0x46   :  { %2753 = vsyncadd [#allocation3], 4294966272 }
  0x47   :  { %2754 = dma.done.wait [#allocation6], 768  }
  0x48   :  { %2755 = vsyncadd [#allocation6], 4294966528 }
  0x49   :  { %2756 = dma.done.wait [#allocation9], 16384  }
  0x4a   :  { %2757 = vsyncadd [#allocation9], 4294950912  ;;  %vm105_vm0 = vcmask 1043456   ;;  %v73_v0 = vld [vmem:[#allocation2] sm:$0xff]  ;;  %v75_v1 = vld [vmem:[#allocation2 + $0x10] sm:$0xff]  ;;  %v171_v40 = vlaneseq  ;;  %vm392_vm1 = vcmask 1041408  }
  0x4b   :  { %v74_v2 = vld [vmem:[#allocation2 + $0x8] sm:$0xff]  ;;  %v89_v3 = vcombine.high %v73_v0, %v73_v0  ;;  %v106_v4 = vsel %vm105_vm0, %v73_v0, 0.0  ;;  %v91_v5 = vcombine.high %v75_v1, %v75_v1  ;;  %v116_v6 = vsel %vm105_vm0, %v75_v1, 0.0  ;;  %v76_v7 = vld [vmem:[#allocation2 + $0x18] sm:$0xff]  ;;  %v77_v8 = vld [vmem:[#allocation2 + $0x20] sm:$0xff] }
  0x4c   :  { %v90_v9 = vcombine.high %v74_v2, %v74_v2  ;;  %v111_v10 = vsel %vm105_vm0, %v74_v2, 0.0  ;;  %v92_v11 = vcombine.high %v76_v7, %v76_v7  ;;  %v121_v12 = vsel %vm105_vm0, %v76_v7, 0.0  ;;  %v78_v13 = vld [vmem:[#allocation2 + $0x28] sm:$0xff]  ;;  %v79_v17 = vld [vmem:[#allocation2 + $0x30] sm:$0xff]  ;;  %v80_v18 = vld [vmem:[#allocation2 + $0x38] sm:$0xff] }
  0x4d   :  { %v107_v14 = vsel %vm105_vm0, %v89_v3, 0.0  ;;  %v117_v15 = vsel %vm105_vm0, %v91_v5, 0.0  ;;  %v93_v16 = vcombine.high %v77_v8, %v77_v8  ;;  %v126_v23 = vsel %vm105_vm0, %v77_v8, 0.0  ;;  %v163_v45 = vld [vmem:[#allocation5] sm:$0xff]  ;;  %v164_v54 = vld [vmem:[#allocation5 + $0x8] sm:$0xff] }
  0x4e   :  { %v108_v19 = vadd.f32 %v107_v14, %v106_v4  ;;  %v118_v20 = vadd.f32 %v117_v15, %v116_v6  ;;  %v112_v21 = vsel %vm105_vm0, %v90_v9, 0.0  ;;  %v122_v22 = vsel %vm105_vm0, %v92_v11, 0.0 }
  0x4f   :  { %v94_v24 = vcombine.high %v78_v13, %v78_v13  ;;  %v113_v25 = vadd.f32 %v112_v21, %v111_v10  ;;  %v123_v26 = vadd.f32 %v122_v22, %v121_v12  ;;  %v127_v27 = vsel %vm105_vm0, %v93_v16, 0.0 }
  0x50   :  { %109 = vadd.xlane.f32.xlu0 %v108_v19  ;;  %119 = vadd.xlane.f32.xlu1 %v118_v20  ;;  %v95_v28 = vcombine.high %v79_v17, %v79_v17  ;;  %v131_v29 = vsel %vm105_vm0, %v78_v13, 0.0  ;;  %v96_v31 = vcombine.high %v80_v18, %v80_v18  ;;  %v136_v32 = vsel %vm105_vm0, %v79_v17, 0.0 }
  0x51   :  { %v132_v30 = vsel %vm105_vm0, %v94_v24, 0.0  ;;  %v141_v33 = vsel %vm105_vm0, %v80_v18, 0.0  ;;  %v128_v36 = vadd.f32 %v127_v27, %v126_v23  ;;  %v2768_v41 = vmov 1983009808  }
  0x52   :  { %v137_v34 = vsel %vm105_vm0, %v95_v28, 0.0  ;;  %v142_v35 = vsel %vm105_vm0, %v96_v31, 0.0  ;;  %v133_v37 = vadd.f32 %v132_v30, %v131_v29  ;;  %v322_v42 = vunpack.c.l.s4 %v2768_v41  ;;  %v165_v31 = vld [vmem:[#allocation5 + $0x10] sm:$0xff] }
  0x53   :  { %v138_v38 = vadd.f32 %v137_v34, %v136_v32  ;;  %v143_v39 = vadd.f32 %v142_v35, %v141_v33  ;;  %v2879_v43 = vshrl.u32 %v171_v40, 7  ;;  %v320_v47 = vcombine.high %v163_v45, %v163_v45 }
  0x54   :  { %114 = vadd.xlane.f32.xlu0 %v113_v25  ;;  %124 = vadd.xlane.f32.xlu1 %v123_v26  ;;  %v323_v44 = vunpack.c.0.s8 %v322_v42  ;;  %v337_v55 = vcombine.high %v164_v54, %v164_v54  ;;  %v2769_v56 = vmov 0   ;;  %v268_v1 = vand.u32 127, %v171_v40 }
  0x55   :  { %473 = vmatprep.mubr.bf16.mxu0 %v2769_v56  ;;  %514 = vmatprep.mubr.bf16.mxu1 %v2769_v56  ;;  %vm301_vm2 = vcmask 1041409   ;;  %vm303_vm3 = vcmask 1042434   ;;  %vm305_vm4 = vcmask 1043459   ;;  %vm307_vm5 = vcmask 1044484  }
  0x56   :  { %v2882_v46 = vsub.s32 %v323_v44, %v2879_v43  ;;  %v271_v8 = vsub.s32 %v268_v1, %v2879_v43  ;;  %vm309_vm6 = vcmask 1045509   ;;  %vm311_vm7 = vcmask 1046534  }
  0x57   :  { %vm313_vm8 = vcmask 1047559   ;;  %vm388_vm9 = vcmask 31744  }
  0x58   :  { %129 = vadd.xlane.f32.xlu0 %v128_v36  ;;  %134 = vadd.xlane.f32.xlu1 %v133_v37  ;;  %v327_v48 = vrot.slane %v163_v45, %v2882_v46  ;;  %v334_v49 = vrot.slane %v320_v47, %v2882_v46  ;;  %v2893_v57 = vrot.slane %v164_v54, %v2882_v46 }
  0x59   :  { %v2896_v58 = vrot.slane %v337_v55, %v2882_v46 }
  0x5a   :  { %v335_v50 = vcombine.high %v327_v48, %v327_v48  ;;  %v336_v51 = vcombine.high %v334_v49, %v334_v49  ;;  %v394_v52 = vsel %vm392_vm1, %v327_v48, 0  ;;  %v400_v53 = vsel %vm392_vm1, %v334_v49, 0 }
  0x5b   :  { %v352_v59 = vcombine.high %v2893_v57, %v2893_v57  ;;  %v353_v60 = vcombine.high %v2896_v58, %v2896_v58  ;;  %v361_v48 = vrot.slane %v165_v31, %v2882_v46  ;;  %v406_v54 = vsel %vm392_vm1, %v2893_v57, 0 }
  0x5c   :  { %139 = vadd.xlane.f32.xlu0 %v138_v38  ;;  %144 = vadd.xlane.f32.xlu1 %v143_v39  ;;  %v354_v39 = vcombine.high %v165_v31, %v165_v31  ;;  %v412_v55 = vsel %vm392_vm1, %v2896_v58, 0  ;;  %v2543_v31 = vld [vmem:[#allocation8 + $0xf8] sm:$0xff]  }
  0x5d   :  { %2170 = vmatprep.subr.msk.bf16.mxu0 %vm392_vm1, %v335_v50  ;;  %2172 = vmatprep.subr.msk.bf16.mxu1 %vm392_vm1, %v336_v51  ;;  %v166_v51 = vld [vmem:[#allocation5 + $0x18] sm:$0xff] }
  0x5e   :  { %442 = vmatpush1.bf16.msra.mxu0 %v394_v52  ;;  %483 = vmatpush1.bf16.msra.mxu1 %v400_v53  ;;  %v368_v49 = vrot.slane %v354_v39, %v2882_v46  ;;  %v378_v57 = vrot.slane %v166_v51, %v2882_v46  ;;  %v173_v39 = vsub.s32 0, %v2879_v43 }
  0x5f   :  { %2174 = vmatprep.subr.msk.bf16.mxu0 %vm392_vm1, %v352_v59  ;;  %2176 = vmatprep.subr.msk.bf16.mxu1 %vm392_vm1, %v353_v60  ;;  %v369_v59 = vcombine.high %v361_v48, %v361_v48 }
  0x60   :  { %v370_v60 = vcombine.high %v368_v49, %v368_v49 }
  0xdd   :  { %v110_v61 = vpop.xlane.xlu0 %109  ;;  %v120_v62 = vpop.xlane.xlu1 %119 }
  0xde   :  { %v147_v63 = vmul.f32 0.00390625, %v110_v61  ;;  %v149_v0 = vmul.f32 0.00390625, %v120_v62  ;;  %v371_v61 = vcombine.high %v166_v51, %v166_v51  ;;  %v418_v62 = vsel %vm392_vm1, %v361_v48, 0 }
  0xe0   :  { %v155_v2 = vpack.c.bf16 %v147_v63, %v147_v63  ;;  %v157_v3 = vpack.c.bf16 %v149_v0, %v149_v0  ;;  %v385_v58 = vrot.slane %v371_v61, %v2882_v46  ;;  %v424_v63 = vsel %vm392_vm1, %v368_v49, 0 }
  0xe1   :  { %v115_v4 = vpop.xlane.xlu0 %114  ;;  %v125_v5 = vpop.xlane.xlu1 %124  ;;  %v386_v0 = vcombine.high %v378_v57, %v378_v57  ;;  %v430_v46 = vsel %vm392_vm1, %v378_v57, 0 }
  0xe2   :  { %v148_v6 = vmul.f32 0.00390625, %v115_v4  ;;  %v150_v7 = vmul.f32 0.00390625, %v125_v5  ;;  %v259_v9 = vunpack.c.l.b16 %v155_v2  ;;  %v261_v12 = vunpack.c.l.b16 %v157_v3  ;;  %v2514_v3 = vld [vmem:[#allocation8 + $0x40] sm:$0xff]  }
  0xe3   :  { %v387_v1 = vcombine.high %v385_v58, %v385_v58  ;;  %v436_v2 = vsel %vm392_vm1, %v385_v58, 0  ;;  %v2515_v4 = vld [vmem:[#allocation8 + $0xc0] sm:$0xff]   ;;  %v193_v58 = vsub.s32 5, %v2879_v43 }
  0xe4   :  { %v156_v10 = vpack.c.bf16 %v148_v6, %v148_v6  ;;  %v158_v11 = vpack.c.bf16 %v150_v7, %v150_v7  ;;  %v272_v19 = vrot.slane %v259_v9, %v271_v8  ;;  %v280_v24 = vrot.slane %v261_v12, %v271_v8  ;;  %v2516_v5 = vld [vmem:[#allocation8] sm:$0xff]   ;;  %v2518_v7 = vld [vmem:[#allocation8 + $0x48] sm:$0xff]   ;;  %v2523_v12 = vld [vmem:[#allocation8 + $0xd0] sm:$0xff]  }
  0xe5   :  { %v130_v13 = vpop.xlane.xlu0 %129  ;;  %v135_v14 = vpop.xlane.xlu1 %134  ;;  %v2517_v6 = vld [vmem:[#allocation8 + $0x80] sm:$0xff]   ;;  %v2520_v9 = vld [vmem:[#allocation8 + $0x8] sm:$0xff]  }
  0xe6   :  { %v260_v15 = vunpack.c.l.b16 %v156_v10  ;;  %v262_v16 = vunpack.c.l.b16 %v158_v11  ;;  %v151_v17 = vmul.f32 0.00390625, %v130_v13  ;;  %v152_v18 = vmul.f32 0.00390625, %v135_v14  ;;  %v2521_v10 = vld [vmem:[#allocation8 + $0x88] sm:$0xff]   ;;  %v2522_v11 = vld [vmem:[#allocation8 + $0x50] sm:$0xff]   ;;  %v2526_v14 = vld [vmem:[#allocation8 + $0x58] sm:$0xff]  }
  0xe7   :  { %v2525_v13 = vld [vmem:[#allocation8 + $0x90] sm:$0xff]  }
  0xe8   :  { %v276_v20 = vrot.slane %v260_v15, %v271_v8  ;;  %v284_v21 = vrot.slane %v262_v16, %v271_v8  ;;  %v159_v22 = vpack.c.bf16 %v151_v17, %v151_v17  ;;  %v160_v23 = vpack.c.bf16 %v152_v18, %v152_v18  ;;  %v2527_v15 = vld [vmem:[#allocation8 + $0xd8] sm:$0xff]   ;;  %v2530_v18 = vld [vmem:[#allocation8 + $0x60] sm:$0xff]  }
  0xe9   :  { %v140_v25 = vpop.xlane.xlu0 %139  ;;  %v145_v26 = vpop.xlane.xlu1 %144  ;;  %v2528_v16 = vld [vmem:[#allocation8 + $0x18] sm:$0xff]  }
  0xea   :  { %v302_v27 = vsel %vm301_vm2, %v276_v20, %v272_v19  ;;  %v263_v28 = vunpack.c.l.b16 %v159_v22  ;;  %v264_v29 = vunpack.c.l.b16 %v160_v23  ;;  %v153_v30 = vmul.f32 0.00390625, %v140_v25  ;;  %v2529_v17 = vld [vmem:[#allocation8 + $0x98] sm:$0xff]   ;;  %v2531_v19 = vld [vmem:[#allocation8 + $0xe0] sm:$0xff]   ;;  %v2534_v22 = vld [vmem:[#allocation8 + $0x68] sm:$0xff]  }
  0xeb   :  { %v304_v32 = vsel %vm303_vm3, %v280_v24, %v302_v27  ;;  %v154_v33 = vmul.f32 0.00390625, %v145_v26  ;;  %v2532_v20 = vld [vmem:[#allocation8 + $0x20] sm:$0xff]   ;;  %v2535_v23 = vld [vmem:[#allocation8 + $0xe8] sm:$0xff]   ;;  %v2538_v26 = vld [vmem:[#allocation8 + $0x70] sm:$0xff]  }
  0xec   :  { %v306_v34 = vsel %vm305_vm4, %v284_v21, %v304_v32  ;;  %v288_v35 = vrot.slane %v263_v28, %v271_v8  ;;  %v161_v36 = vpack.c.bf16 %v153_v30, %v153_v30  ;;  %v292_v37 = vrot.slane %v264_v29, %v271_v8  ;;  %v2533_v21 = vld [vmem:[#allocation8 + $0xa0] sm:$0xff]   ;;  %v2536_v24 = vld [vmem:[#allocation8 + $0x28] sm:$0xff]   ;;  %v2539_v27 = vld [vmem:[#allocation8 + $0xf0] sm:$0xff]  }
  0xed   :  { %v162_v38 = vpack.c.bf16 %v154_v33, %v154_v33  ;;  %v2537_v25 = vld [vmem:[#allocation8 + $0xa8] sm:$0xff]   ;;  %v2540_v28 = vld [vmem:[#allocation8 + $0x30] sm:$0xff]   ;;  %v2542_v30 = vld [vmem:[#allocation8 + $0x78] sm:$0xff]  }
  0xee   :  { %v308_v40 = vsel %vm307_vm5, %v288_v35, %v306_v34  ;;  %v265_v41 = vunpack.c.l.b16 %v161_v36  ;;  %v2541_v29 = vld [vmem:[#allocation8 + $0xb0] sm:$0xff]   ;;  %v2544_v32 = vld [vmem:[#allocation8 + $0x38] sm:$0xff]   ;;  %v2546_v34 = vld [vmem:[#allocation8 + $0x140] sm:$0xff]   ;;  %v197_v36 = vsub.s32 6, %v2879_v43 }
  0xef   :  { %v266_v42 = vunpack.c.l.b16 %v162_v38  ;;  %v310_v45 = vsel %vm309_vm6, %v292_v37, %v308_v40  ;;  %v2545_v33 = vld [vmem:[#allocation8 + $0xb8] sm:$0xff]   ;;  %v2547_v35 = vld [vmem:[#allocation8 + $0x1c0] sm:$0xff]   ;;  %v181_v40 = vsub.s32 2, %v2879_v43 }
  0xf0   :  { %v296_v44 = vrot.slane %v265_v41, %v271_v8  ;;  %v2936_v37 = vld [vmem:[#allocation7 + $0x8] sm:$0xff]  ;;  %v2945_v41 = vld [vmem:[#allocation7] sm:$0xff] }
  0xf1   :  { %v300_v47 = vrot.slane %v266_v42, %v271_v8  ;;  %v2519_v8 = vld [vmem:[#allocation8 + $0xc8] sm:$0xff]   ;;  %v2941_v38 = vrot.slane %v2936_v37, %v197_v36  ;;  %v177_v42 = vsub.s32 1, %v2879_v43 }
  0xf2   :  { %v312_v50 = vsel %vm311_vm7, %v296_v44, %v310_v45  ;;  %v185_v44 = vsub.s32 3, %v2879_v43  ;;  %v174_v45 = vrot.slane %v2945_v41, %v173_v39 }
  0xf3   :  { %v314_v52 = vsel %vm313_vm8, %v300_v47, %v312_v50  ;;  %v182_v47 = vrot.slane %v2945_v41, %v181_v40  ;;  %v178_v48 = vrot.slane %v2945_v41, %v177_v42 }
  0xf4   :  { %v315_v53 = vpack.c.b16 %v314_v52, %v314_v52  ;;  %v186_v49 = vrot.slane %v2945_v41, %v185_v44 }
  0xf6   :  { %2171 = vmatmul.mubr.msk.bf16.vlgmr.msra.gmra.mrb[0].mxu0 %vm388_vm9, %v315_v53  ;;  %2173 = vmatmul.mubr.msk.bf16.vlgmr.msra.gmra.mrb[0].mxu1 %vm388_vm9, %v315_v53 }
  0xf7   :  { %524 = vmatpush1.bf16.msra.mxu0 %v406_v54  ;;  %565 = vmatpush1.bf16.msra.mxu1 %v412_v55 }
  0xf8   :  { %555 = vmatprep.mubr.bf16.mxu0 %v2769_v56  ;;  %596 = vmatprep.mubr.bf16.mxu1 %v2769_v56 }
  0xf9   :  { %2178 = vmatprep.subr.msk.bf16.mxu0 %vm392_vm1, %v369_v59  ;;  %2180 = vmatprep.subr.msk.bf16.mxu1 %vm392_vm1, %v370_v60 }
  0xfe   :  { %2175 = vmatmul.mubr.msk.bf16.vlgmr.msra.gmra.mrb[4].mxu0 %vm388_vm9, %v315_v53  ;;  %2177 = vmatmul.mubr.msk.bf16.vlgmr.msra.gmra.mrb[4].mxu1 %vm388_vm9, %v315_v53 }
  0xff   :  { %606 = vmatpush1.bf16.msra.mxu0 %v418_v62  ;;  %647 = vmatpush1.bf16.msra.mxu1 %v424_v63  ;;  %v201_v62 = vsub.s32 7, %v2879_v43 }
 0x100   :  { %637 = vmatprep.mubr.bf16.mxu0 %v2769_v56  ;;  %678 = vmatprep.mubr.bf16.mxu1 %v2769_v56 }
 0x101   :  { %2182 = vmatprep.subr.msk.bf16.mxu0 %vm392_vm1, %v386_v0  ;;  %2184 = vmatprep.subr.msk.bf16.mxu1 %vm392_vm1, %v387_v1 }
 0x106   :  { %2179 = vmatmul.mubr.msk.bf16.vlgmr.msra.gmra.mrb[8].mxu0 %vm388_vm9, %v315_v53  ;;  %2181 = vmatmul.mubr.msk.bf16.vlgmr.msra.gmra.mrb[8].mxu1 %vm388_vm9, %v315_v53 }
 0x107   :  { %688 = vmatpush1.bf16.msra.mxu0 %v430_v46  ;;  %729 = vmatpush1.bf16.msra.mxu1 %v436_v2 }
 0x108   :  { %719 = vmatprep.mubr.bf16.mxu0 %v2769_v56  ;;  %760 = vmatprep.mubr.bf16.mxu1 %v2769_v56  ;;  %v2524_v56 = vld [vmem:[#allocation8 + $0x10] sm:$0xff]  }
 0x109   :  { %2315 = vmatprep.subr.bf16.mxu0 %v2514_v3  ;;  %2337 = vmatprep.subr.bf16.mxu1 %v2515_v4 }
 0x10e   :  { %2183 = vmatmul.mubr.msk.bf16.vlgmr.msra.gmra.mrb[12].mxu0 %vm388_vm9, %v315_v53  ;;  %2185 = vmatmul.mubr.msk.bf16.vlgmr.msra.gmra.mrb[12].mxu1 %vm388_vm9, %v315_v53 }
 0x10f   :  { %2316 = vmatpush3.bf16.msra.mxu0 %v2516_v5  ;;  %2338 = vmatpush3.bf16.msra.mxu1 %v2517_v6  ;;  %v194_v6 = vrot.slane %v2945_v41, %v193_v58 }
 0x110   :  { %2317 = vmatprep.subr.bf16.mxu0 %v2518_v7  ;;  %2339 = vmatprep.subr.bf16.mxu1 %v2519_v8  ;;  %v202_v7 = vrot.slane %v2945_v41, %v201_v62  ;;  %v2548_v8 = vld [vmem:[#allocation8 + $0x100] sm:$0xff]  }
 0x113   :  { %2318 = vmatpush3.bf16.msra.mxu0 %v2520_v9  ;;  %2340 = vmatpush3.bf16.msra.mxu1 %v2521_v10  ;;  %v2549_v9 = vld [vmem:[#allocation8 + $0x180] sm:$0xff]  }
 0x114   :  { %2319 = vmatprep.subr.bf16.mxu0 %v2522_v11  ;;  %2341 = vmatprep.subr.bf16.mxu1 %v2523_v12  ;;  %v2550_v12 = vld [vmem:[#allocation8 + $0x148] sm:$0xff]  }
 0x117   :  { %2320 = vmatpush3.bf16.msra.mxu0 %v2524_v56  ;;  %2342 = vmatpush3.bf16.msra.mxu1 %v2525_v13  ;;  %v2551_v56 = vld [vmem:[#allocation8 + $0x1c8] sm:$0xff]  }
 0x118   :  { %2321 = vmatprep.subr.bf16.mxu0 %v2526_v14  ;;  %2343 = vmatprep.subr.bf16.mxu1 %v2527_v15 }
 0x11b   :  { %2322 = vmatpush3.bf16.msra.mxu0 %v2528_v16  ;;  %2344 = vmatpush3.bf16.msra.mxu1 %v2529_v17 }
 0x11c   :  { %2323 = vmatprep.subr.bf16.mxu0 %v2530_v18  ;;  %2345 = vmatprep.subr.bf16.mxu1 %v2531_v19 }
 0x11f   :  { %2324 = vmatpush3.bf16.msra.mxu0 %v2532_v20  ;;  %2346 = vmatpush3.bf16.msra.mxu1 %v2533_v21  ;;  %v2552_v21 = vld [vmem:[#allocation8 + $0x108] sm:$0xff]  }
 0x120   :  { %2325 = vmatprep.subr.bf16.mxu0 %v2534_v22  ;;  %2347 = vmatprep.subr.bf16.mxu1 %v2535_v23  ;;  %v2553_v22 = vld [vmem:[#allocation8 + $0x188] sm:$0xff]  }
 0x123   :  { %2326 = vmatpush3.bf16.msra.mxu0 %v2536_v24  ;;  %2348 = vmatpush3.bf16.msra.mxu1 %v2537_v25  ;;  %v2554_v25 = vld [vmem:[#allocation8 + $0x150] sm:$0xff]  }
 0x124   :  { %2327 = vmatprep.subr.bf16.mxu0 %v2538_v26  ;;  %2349 = vmatprep.subr.bf16.mxu1 %v2539_v27  ;;  %v2555_v26 = vld [vmem:[#allocation8 + $0x1d0] sm:$0xff]  }
 0x127   :  { %2328 = vmatpush3.bf16.msra.mxu0 %v2540_v28  ;;  %2350 = vmatpush3.bf16.msra.mxu1 %v2541_v29  ;;  %v206_v29 = vrot.slane %v2936_v37, %v173_v39 }
 0x128   :  { %2329 = vmatprep.subr.bf16.mxu0 %v2542_v30  ;;  %2351 = vmatprep.subr.bf16.mxu1 %v2543_v31  ;;  %v214_v30 = vrot.slane %v2936_v37, %v181_v40 }
 0x12b   :  { %2330 = vmatpush3.bf16.msra.mxu0 %v2544_v32  ;;  %2352 = vmatpush3.bf16.msra.mxu1 %v2545_v33  ;;  %v2556_v33 = vld [vmem:[#allocation8 + $0x110] sm:$0xff]  }
 0x12c   :  { %2359 = vmatprep.subr.bf16.mxu0 %v2546_v34  ;;  %2381 = vmatprep.subr.bf16.mxu1 %v2547_v35  ;;  %v2557_v34 = vld [vmem:[#allocation8 + $0x190] sm:$0xff]   ;;  %v2558_v35 = vld [vmem:[#allocation8 + $0x158] sm:$0xff]  }
 0x1c9   :  { %v475_v50 = vpop.f32.mrb[0].mxu0  ;;  %v516_v51 = vpop.f32.mrb[0].mxu1 }
 0x1ca   :  { %v476_v52 = vadd.f32 %v475_v50, %v174_v45  ;;  %v517_v53 = vadd.f32 %v516_v51, %v182_v47  ;;  %v477_v54 = vpop.f32.mrb[1].mxu0  ;;  %v518_v55 = vpop.f32.mrb[1].mxu1  ;;  %v2559_v45 = vld [vmem:[#allocation8 + $0x1d8] sm:$0xff]  }
 0x1cb   :  { %v478_v59 = vadd.f32 %v477_v54, %v178_v48  ;;  %v519_v60 = vadd.f32 %v518_v55, %v186_v49  ;;  %v479_v61 = vpop.f32.mrb[2].mxu0  ;;  %v520_v57 = vpop.f32.mrb[2].mxu1  ;;  %v2561_v54 = vld [vmem:[#allocation8 + $0x198] sm:$0xff]   ;;  %v189_v55 = vsub.s32 4, %v2879_v43 }
 0x1cc   :  { %v769_v63 = vmax.f32 %v476_v52, 0.0  ;;  %v771_v0 = vmax.f32 %v517_v53, 0.0  ;;  %v480_v1 = vpop.f32.mrb[3].mxu0  ;;  %v521_v46 = vpop.f32.mrb[3].mxu1  ;;  %v2560_v53 = vld [vmem:[#allocation8 + $0x118] sm:$0xff]   ;;  %v2562_v61 = vld [vmem:[#allocation8 + $0x160] sm:$0xff]  }
 0x1cd   :  { %v770_v2 = vmax.f32 %v478_v59, 0.0  ;;  %v772_v3 = vmax.f32 %v519_v60, 0.0  ;;  %v2563_v57 = vld [vmem:[#allocation8 + $0x1e0] sm:$0xff]   ;;  %v2566_v46 = vld [vmem:[#allocation8 + $0x168] sm:$0xff]   ;;  %v2609_v43 = vld [vmem:[#allocation8 + $0x2b8] sm:$0xff]  }
 0x1ce   :  { %v785_v10 = vpack.c.bf16 %v769_v63, %v769_v63  ;;  %v787_v11 = vpack.c.bf16 %v771_v0, %v771_v0  ;;  %v222_v63 = vrot.slane %v2936_v37, %v189_v55  ;;  %v2564_v0 = vld [vmem:[#allocation8 + $0x120] sm:$0xff]  }
 0x1cf   :  { %v786_v4 = vpack.c.bf16 %v770_v2, %v770_v2  ;;  %v788_v5 = vpack.c.bf16 %v772_v3, %v772_v3  ;;  %v2565_v1 = vld [vmem:[#allocation8 + $0x1a0] sm:$0xff]   ;;  %v2567_v2 = vld [vmem:[#allocation8 + $0x1e8] sm:$0xff]  }
 0x1d1   :  { %v2965_v13 = vpop.f32.mrb[4].mxu0  ;;  %v2967_v14 = vpop.f32.mrb[4].mxu1  ;;  %1864 = vmatprep.mubr.bf16.mxu0 %v786_v4  ;;  %1904 = vmatprep.mubr.bf16.mxu1 %v788_v5 }
 0x1d2   :  { %v559_v15 = vpop.f32.mrb[5].mxu0  ;;  %v600_v16 = vpop.f32.mrb[5].mxu1  ;;  %1865 = vmatmul.mubr.bf16.vlgmr.msra.gmra.mrb[16].mxu0 %v785_v10  ;;  %1905 = vmatmul.mubr.bf16.vlgmr.msra.gmra.mrb[16].mxu1 %v787_v11  ;;  %v2568_v11 = vld [vmem:[#allocation8 + $0x128] sm:$0xff]  }
 0x1d3   :  { %v560_v17 = vadd.f32 %v559_v15, %v194_v6  ;;  %v601_v18 = vadd.f32 %v600_v16, %v202_v7  ;;  %2360 = vmatpush3.bf16.msra.mxu0 %v2548_v8  ;;  %2382 = vmatpush3.bf16.msra.mxu1 %v2549_v9  ;;  %v561_v19 = vpop.f32.mrb[6].mxu0  ;;  %v602_v20 = vpop.f32.mrb[6].mxu1  ;;  %v198_v15 = vrot.slane %v2945_v41, %v197_v36 }
 0x1d4   :  { %v562_v23 = vpop.f32.mrb[7].mxu0  ;;  %v603_v24 = vpop.f32.mrb[7].mxu1  ;;  %2361 = vmatprep.subr.bf16.mxu0 %v2550_v12  ;;  %2383 = vmatprep.subr.bf16.mxu1 %v2551_v56  ;;  %v2569_v12 = vld [vmem:[#allocation8 + $0x1a8] sm:$0xff]   ;;  %v190_v56 = vrot.slane %v2945_v41, %v189_v55  ;;  %v210_v19 = vrot.slane %v2936_v37, %v177_v42  ;;  %v218_v20 = vrot.slane %v2936_v37, %v185_v44  ;;  %v2576_v42 = vld [vmem:[#allocation8 + $0x138] sm:$0xff]  }
 0x1d5   :  { %v774_v27 = vmax.f32 %v560_v17, 0.0  ;;  %v776_v28 = vmax.f32 %v601_v18, 0.0  ;;  %v2571_v18 = vld [vmem:[#allocation8 + $0x1f0] sm:$0xff]   ;;  %v599_v41 = vadd.f32 %v2967_v14, %v198_v15  ;;  %v2574_v23 = vld [vmem:[#allocation8 + $0x178] sm:$0xff]   ;;  %v2580_v14 = vld [vmem:[#allocation8 + $0x200] sm:$0xff]  }
 0x1d6   :  { %v558_v36 = vadd.f32 %v2965_v13, %v190_v56  ;;  %v2575_v24 = vld [vmem:[#allocation8 + $0x1f8] sm:$0xff]   ;;  %v2604_v56 = vld [vmem:[#allocation8 + $0x230] sm:$0xff]  }
 0x1d7   :  { %v790_v31 = vpack.c.bf16 %v774_v27, %v774_v27  ;;  %v792_v32 = vpack.c.bf16 %v776_v28, %v776_v28  ;;  %2362 = vmatpush3.bf16.msra.mxu0 %v2552_v21  ;;  %2384 = vmatpush3.bf16.msra.mxu1 %v2553_v22  ;;  %v2572_v21 = vld [vmem:[#allocation8 + $0x130] sm:$0xff]   ;;  %v2577_v27 = vld [vmem:[#allocation8 + $0x1b8] sm:$0xff]   ;;  %v775_v44 = vmax.f32 %v599_v41, 0.0 }
 0x1d8   :  { %2363 = vmatprep.subr.bf16.mxu0 %v2554_v25  ;;  %2385 = vmatprep.subr.bf16.mxu1 %v2555_v26  ;;  %v2573_v22 = vld [vmem:[#allocation8 + $0x1b0] sm:$0xff]   ;;  %v773_v28 = vmax.f32 %v558_v36, 0.0  ;;  %v2590_v55 = vld [vmem:[#allocation8 + $0x258] sm:$0xff]   ;;  %v2612_v36 = vld [vmem:[#allocation8 + $0x300] sm:$0xff]  }
 0x1d9   :  { %v639_v47 = vpop.f32.mrb[8].mxu0  ;;  %v680_v48 = vpop.f32.mrb[8].mxu1  ;;  %1944 = vmatprep.mubr.bf16.mxu0 %v790_v31  ;;  %1984 = vmatprep.mubr.bf16.mxu1 %v792_v32  ;;  %v2605_v15 = vld [vmem:[#allocation8 + $0x2b0] sm:$0xff]  }
 0x1da   :  { %v2971_v49 = vadd.f32 %v639_v47, %v206_v29  ;;  %v2973_v50 = vadd.f32 %v680_v48, %v214_v30  ;;  %v641_v39 = vpop.f32.mrb[9].mxu0  ;;  %v682_v40 = vpop.f32.mrb[9].mxu1  ;;  %v2578_v29 = vld [vmem:[#allocation8 + $0x240] sm:$0xff]   ;;  %v789_v32 = vpack.c.bf16 %v773_v28, %v773_v28  ;;  %v2583_v47 = vld [vmem:[#allocation8 + $0x2c8] sm:$0xff]   ;;  %v2620_v28 = vld [vmem:[#allocation8 + $0x310] sm:$0xff]  }
 0x1db   :  { %2364 = vmatpush3.bf16.msra.mxu0 %v2556_v33  ;;  %2386 = vmatpush3.bf16.msra.mxu1 %v2557_v34  ;;  %v643_v51 = vpop.f32.mrb[10].mxu0  ;;  %v684_v52 = vpop.f32.mrb[10].mxu1  ;;  %v642_v25 = vadd.f32 %v641_v39, %v210_v19  ;;  %v683_v26 = vadd.f32 %v682_v40, %v218_v20  ;;  %v2579_v30 = vld [vmem:[#allocation8 + $0x2c0] sm:$0xff]   ;;  %v791_v33 = vpack.c.bf16 %v775_v44, %v775_v44  ;;  %v2584_v39 = vld [vmem:[#allocation8 + $0x208] sm:$0xff]   ;;  %v2608_v19 = vld [vmem:[#allocation8 + $0x238] sm:$0xff]  }
 0x1dc   :  { %v644_v59 = vpop.f32.mrb[11].mxu0  ;;  %v685_v60 = vpop.f32.mrb[11].mxu1  ;;  %2365 = vmatprep.subr.bf16.mxu0 %v2558_v35  ;;  %2387 = vmatprep.subr.bf16.mxu1 %v2559_v45  ;;  %v2581_v34 = vld [vmem:[#allocation8 + $0x280] sm:$0xff]   ;;  %v2582_v45 = vld [vmem:[#allocation8 + $0x248] sm:$0xff]   ;;  %v2586_v51 = vld [vmem:[#allocation8 + $0x250] sm:$0xff]  }
 0x1dd   :  { %v778_v31 = vmax.f32 %v642_v25, 0.0  ;;  %v780_v13 = vmax.f32 %v683_v26, 0.0  ;;  %v2585_v40 = vld [vmem:[#allocation8 + $0x288] sm:$0xff]   ;;  %v2587_v52 = vld [vmem:[#allocation8 + $0x2d0] sm:$0xff]   ;;  %v2591_v59 = vld [vmem:[#allocation8 + $0x2d8] sm:$0xff]  }
 0x1de   :  { %v2592_v60 = vld [vmem:[#allocation8 + $0x218] sm:$0xff]   ;;  %v2611_v20 = vld [vmem:[#allocation8 + $0x3c0] sm:$0xff]   ;;  %v2617_v26 = vld [vmem:[#allocation8 + $0x388] sm:$0xff]  }
 0x1df   :  { %2366 = vmatpush3.bf16.msra.mxu0 %v2560_v53  ;;  %2388 = vmatpush3.bf16.msra.mxu1 %v2561_v54  ;;  %v794_v35 = vpack.c.bf16 %v778_v31, %v778_v31  ;;  %v796_v48 = vpack.c.bf16 %v780_v13, %v780_v13  ;;  %v2588_v53 = vld [vmem:[#allocation8 + $0x210] sm:$0xff]   ;;  %v2624_v31 = vld [vmem:[#allocation8 + $0x318] sm:$0xff]  }
 0x1e0   :  { %2367 = vmatprep.subr.bf16.mxu0 %v2562_v61  ;;  %2389 = vmatprep.subr.bf16.mxu1 %v2563_v57  ;;  %v2589_v54 = vld [vmem:[#allocation8 + $0x290] sm:$0xff]   ;;  %v2593_v61 = vld [vmem:[#allocation8 + $0x298] sm:$0xff]   ;;  %v2594_v57 = vld [vmem:[#allocation8 + $0x260] sm:$0xff]  }
 0x1e1   :  { %v721_v3 = vpop.f32.mrb[12].mxu0  ;;  %v762_v4 = vpop.f32.mrb[12].mxu1  ;;  %v2621_v44 = vld [vmem:[#allocation8 + $0x390] sm:$0xff]   ;;  %v2625_v13 = vld [vmem:[#allocation8 + $0x398] sm:$0xff]  }
 0x1e2   :  { %v2977_v5 = vadd.f32 %v721_v3, %v222_v63  ;;  %v2980_v6 = vadd.f32 %v762_v4, %v2941_v38  ;;  %v2982_v7 = vpop.f32.mrb[13].mxu0  ;;  %v2984_v8 = vpop.f32.mrb[13].mxu1  ;;  %v2570_v38 = vld [vmem:[#allocation8 + $0x170] sm:$0xff]   ;;  %v2595_v63 = vld [vmem:[#allocation8 + $0x2e0] sm:$0xff]   ;;  %v2600_v3 = vld [vmem:[#allocation8 + $0x228] sm:$0xff]  }
 0x1e3   :  { %2368 = vmatpush3.bf16.msra.mxu0 %v2564_v0  ;;  %2390 = vmatpush3.bf16.msra.mxu1 %v2565_v1  ;;  %v725_v9 = vpop.f32.mrb[14].mxu0  ;;  %v766_v10 = vpop.f32.mrb[14].mxu1  ;;  %v2596_v0 = vld [vmem:[#allocation8 + $0x220] sm:$0xff]   ;;  %v2601_v4 = vld [vmem:[#allocation8 + $0x2a8] sm:$0xff]  }
 0x1e4   :  { %v726_v16 = vpop.f32.mrb[15].mxu0  ;;  %v767_v17 = vpop.f32.mrb[15].mxu1  ;;  %2369 = vmatprep.subr.bf16.mxu0 %v2566_v46  ;;  %2391 = vmatprep.subr.bf16.mxu1 %v2567_v2  ;;  %v2597_v1 = vld [vmem:[#allocation8 + $0x2a0] sm:$0xff]   ;;  %v2598_v46 = vld [vmem:[#allocation8 + $0x268] sm:$0xff]   ;;  %v2602_v9 = vld [vmem:[#allocation8 + $0x270] sm:$0xff]  }
 0x1e5   :  { %v2599_v2 = vld [vmem:[#allocation8 + $0x2e8] sm:$0xff]   ;;  %v2603_v10 = vld [vmem:[#allocation8 + $0x2f0] sm:$0xff]   ;;  %v2606_v16 = vld [vmem:[#allocation8 + $0x278] sm:$0xff]  }
 0x1e6   :  { %v2607_v17 = vld [vmem:[#allocation8 + $0x2f8] sm:$0xff]  }
 0x1e7   :  { %2370 = vmatpush3.bf16.msra.mxu0 %v2568_v11  ;;  %2392 = vmatpush3.bf16.msra.mxu1 %v2569_v12  ;;  %v226_v11 = vrot.slane %v2936_v37, %v193_v58  ;;  %v234_v12 = vrot.slane %v2936_v37, %v201_v62  ;;  %v777_v58 = vmax.f32 %v2971_v49, 0.0  ;;  %v2610_v37 = vld [vmem:[#allocation8 + $0x340] sm:$0xff]   ;;  %v779_v62 = vmax.f32 %v2973_v50, 0.0  ;;  %v2616_v50 = vld [vmem:[#allocation8 + $0x308] sm:$0xff]  }
 0x1e8   :  { %2371 = vmatprep.subr.bf16.mxu0 %v2570_v38  ;;  %2393 = vmatprep.subr.bf16.mxu1 %v2571_v18 }
 0x1e9   :  { %v724_v38 = vadd.f32 %v2982_v7, %v226_v11  ;;  %v765_v18 = vadd.f32 %v2984_v8, %v234_v12  ;;  %v793_v41 = vpack.c.bf16 %v777_v58, %v777_v58  ;;  %v2613_v7 = vld [vmem:[#allocation8 + $0x380] sm:$0xff]   ;;  %v795_v8 = vpack.c.bf16 %v779_v62, %v779_v62 }
 0x1eb   :  { %2372 = vmatpush3.bf16.msra.mxu0 %v2572_v21  ;;  %2394 = vmatpush3.bf16.msra.mxu1 %v2573_v22  ;;  %v782_v21 = vmax.f32 %v724_v38, 0.0  ;;  %v784_v22 = vmax.f32 %v765_v18, 0.0 }
 0x1ec   :  { %2373 = vmatprep.subr.bf16.mxu0 %v2574_v23  ;;  %2395 = vmatprep.subr.bf16.mxu1 %v2575_v24  ;;  %v2614_v23 = vld [vmem:[#allocation8 + $0x348] sm:$0xff]  }
 0x1ed   :  { %v798_v49 = vpack.c.bf16 %v782_v21, %v782_v21  ;;  %v2615_v24 = vld [vmem:[#allocation8 + $0x3c8] sm:$0xff]   ;;  %v800_v25 = vpack.c.bf16 %v784_v22, %v784_v22 }
 0x1ef   :  { %2374 = vmatpush3.bf16.msra.mxu0 %v2576_v42  ;;  %2396 = vmatpush3.bf16.msra.mxu1 %v2577_v27  ;;  %v2618_v42 = vld [vmem:[#allocation8 + $0x350] sm:$0xff]  }
 0x1f0   :  { %2403 = vmatprep.subr.bf16.mxu0 %v2578_v29  ;;  %2425 = vmatprep.subr.bf16.mxu1 %v2579_v30  ;;  %v2619_v27 = vld [vmem:[#allocation8 + $0x3d0] sm:$0xff]   ;;  %v2622_v29 = vld [vmem:[#allocation8 + $0x358] sm:$0xff]  }
 0x1f1   :  { %v2623_v30 = vld [vmem:[#allocation8 + $0x3d8] sm:$0xff]  }
 0x1f2   :  { %1945 = vmatmul.mubr.bf16.vlgmr.msra.gmra.mrb[20].mxu0 %v789_v32  ;;  %1985 = vmatmul.mubr.bf16.vlgmr.msra.gmra.mrb[20].mxu1 %v791_v33  ;;  %v2627_v32 = vld [vmem:[#allocation8 + $0x3e0] sm:$0xff]  }
 0x1f3   :  { %2404 = vmatpush3.bf16.msra.mxu0 %v2580_v14  ;;  %2024 = vmatprep.mubr.bf16.mxu0 %v794_v35  ;;  %v2626_v14 = vld [vmem:[#allocation8 + $0x360] sm:$0xff]   ;;  %v2630_v35 = vld [vmem:[#allocation8 + $0x368] sm:$0xff]  }
 0x1f4   :  { %2426 = vmatpush3.bf16.msra.mxu1 %v2581_v34  ;;  %2064 = vmatprep.mubr.bf16.mxu1 %v796_v48  ;;  %v2628_v33 = vld [vmem:[#allocation8 + $0x320] sm:$0xff]   ;;  %v2633_v48 = vld [vmem:[#allocation8 + $0x3a8] sm:$0xff]  }
 0x1f5   :  { %2405 = vmatprep.subr.bf16.mxu0 %v2582_v45  ;;  %2427 = vmatprep.subr.bf16.mxu1 %v2583_v47  ;;  %v2629_v34 = vld [vmem:[#allocation8 + $0x3a0] sm:$0xff]   ;;  %v2631_v45 = vld [vmem:[#allocation8 + $0x3e8] sm:$0xff]  }
 0x1f6   :  { %v2632_v47 = vld [vmem:[#allocation8 + $0x328] sm:$0xff]  }
 0x1f7   :  { %2406 = vmatpush3.bf16.msra.mxu0 %v2584_v39  ;;  %v2634_v39 = vld [vmem:[#allocation8 + $0x370] sm:$0xff]  }
 0x1f8   :  { %2428 = vmatpush3.bf16.msra.mxu1 %v2585_v40  ;;  %2407 = vmatprep.subr.bf16.mxu0 %v2586_v51  ;;  %v2635_v40 = vld [vmem:[#allocation8 + $0x3f0] sm:$0xff]  }
 0x1f9   :  { %2429 = vmatprep.subr.bf16.mxu1 %v2587_v52  ;;  %v2636_v51 = vld [vmem:[#allocation8 + $0x330] sm:$0xff]  }
 0x1fa   :  { %v2637_v52 = vld [vmem:[#allocation8 + $0x3b0] sm:$0xff]  }
 0x1fb   :  { %2408 = vmatpush3.bf16.msra.mxu0 %v2588_v53  ;;  %v2638_v53 = vld [vmem:[#allocation8 + $0x378] sm:$0xff]  }
 0x1fc   :  { %2430 = vmatpush3.bf16.msra.mxu1 %v2589_v54  ;;  %2409 = vmatprep.subr.bf16.mxu0 %v2590_v55  ;;  %v2639_v54 = vld [vmem:[#allocation8 + $0x3f8] sm:$0xff]  }
 0x1fd   :  { %2431 = vmatprep.subr.bf16.mxu1 %v2591_v59  ;;  %v2640_v55 = vld [vmem:[#allocation8 + $0x338] sm:$0xff]   ;;  %v781_v59 = vmax.f32 %v2977_v5, 0.0 }
 0x1ff   :  { %2410 = vmatpush3.bf16.msra.mxu0 %v2592_v60  ;;  %v2641_v60 = vld [vmem:[#allocation8 + $0x3b8] sm:$0xff]  }
 0x200   :  { %2432 = vmatpush3.bf16.msra.mxu1 %v2593_v61  ;;  %2411 = vmatprep.subr.bf16.mxu0 %v2594_v57  ;;  %v783_v61 = vmax.f32 %v2980_v6, 0.0  ;;  %v797_v57 = vpack.c.bf16 %v781_v59, %v781_v59 }
 0x201   :  { %2433 = vmatprep.subr.bf16.mxu1 %v2595_v63 }
 0x202   :  { %v799_v63 = vpack.c.bf16 %v783_v61, %v783_v61 }
 0x203   :  { %2412 = vmatpush3.bf16.msra.mxu0 %v2596_v0 }
 0x204   :  { %2434 = vmatpush3.bf16.msra.mxu1 %v2597_v1  ;;  %2413 = vmatprep.subr.bf16.mxu0 %v2598_v46  ;;  %v2186_v46 = vld [vmem:[%s3029_s4] ss:$0 sm:$0xff]  ;;  %s2770_s4 = smov [#allocation10]  }
 0x205   :  { %2435 = vmatprep.subr.bf16.mxu1 %v2599_v2  ;;  %s2159_s17 = sshll.u32 %s2770_s4, 4  ;;  %s2160_s17 = int_to_ptr.vmem [resolvable:$true] %s2159_s17 }
 0x206   :  { %s2730_s18 = scalar_lea.vmem %s2160_s17, 128  ;;  %p2735_p5 = scmp.lt.s32.totalorder %s2160_s17, %s2160_s17 }
 0x207   :  { %2414 = vmatpush3.bf16.msra.mxu0 %v2600_v3  ;;  %p2731_p4 = scmp.ne.s32.totalorder %s2160_s17, %s2730_s18  ;;  %p2736_p6 = scmp.lt.s32.totalorder %s2730_s18, %s2730_s18 }
 0x208   :  { %2436 = vmatpush3.bf16.msra.mxu1 %v2601_v4  ;;  %2415 = vmatprep.subr.bf16.mxu0 %v2602_v9 }
 0x209   :  { %2437 = vmatprep.subr.bf16.mxu1 %v2603_v10  ;;  %p2737_p7 = por %p2736_p6, %p2735_p5 }
 0x20b   :  { %2416 = vmatpush3.bf16.msra.mxu0 %v2604_v56  ;;  %p2738_p8 = pnand %p2737_p7, %p2731_p4 }
 0x20c   :  { %2438 = vmatpush3.bf16.msra.mxu1 %v2605_v15  ;;  %2417 = vmatprep.subr.bf16.mxu0 %v2606_v16 }
 0x20d   :  { %2439 = vmatprep.subr.bf16.mxu1 %v2607_v17 }
 0x20f   :  { %2418 = vmatpush3.bf16.msra.mxu0 %v2608_v19 }
 0x210   :  { %2440 = vmatpush3.bf16.msra.mxu1 %v2609_v43  ;;  %2447 = vmatprep.subr.bf16.mxu0 %v2610_v37 }
 0x211   :  { %2469 = vmatprep.subr.bf16.mxu1 %v2611_v20 }
 0x212   :  { %2025 = vmatmul.mubr.bf16.vlgmr.msra.gmra.mrb[24].mxu0 %v793_v41 }
 0x213   :  { %2065 = vmatmul.mubr.bf16.vlgmr.msra.gmra.mrb[24].mxu1 %v795_v8  ;;  %2448 = vmatpush3.bf16.msra.mxu0 %v2612_v36 }
 0x214   :  { %2104 = vmatprep.mubr.bf16.mxu0 %v798_v49  ;;  %2470 = vmatpush3.bf16.msra.mxu1 %v2613_v7 }
 0x215   :  { %2144 = vmatprep.mubr.bf16.mxu1 %v800_v25  ;;  %2449 = vmatprep.subr.bf16.mxu0 %v2614_v23 }
 0x216   :  { %2471 = vmatprep.subr.bf16.mxu1 %v2615_v24 }
 0x217   :  { %2450 = vmatpush3.bf16.msra.mxu0 %v2616_v50 }
 0x218   :  { %2472 = vmatpush3.bf16.msra.mxu1 %v2617_v26  ;;  %2451 = vmatprep.subr.bf16.mxu0 %v2618_v42 }
 0x219   :  { %2473 = vmatprep.subr.bf16.mxu1 %v2619_v27 }
 0x21b   :  { %2452 = vmatpush3.bf16.msra.mxu0 %v2620_v28 }
 0x21c   :  { %2474 = vmatpush3.bf16.msra.mxu1 %v2621_v44  ;;  %2453 = vmatprep.subr.bf16.mxu0 %v2622_v29 }
 0x21d   :  { %2475 = vmatprep.subr.bf16.mxu1 %v2623_v30 }
 0x21f   :  { %2454 = vmatpush3.bf16.msra.mxu0 %v2624_v31 }
 0x220   :  { %2476 = vmatpush3.bf16.msra.mxu1 %v2625_v13  ;;  %2455 = vmatprep.subr.bf16.mxu0 %v2626_v14 }
 0x221   :  { %2477 = vmatprep.subr.bf16.mxu1 %v2627_v32 }
 0x223   :  { %2456 = vmatpush3.bf16.msra.mxu0 %v2628_v33 }
 0x224   :  { %2478 = vmatpush3.bf16.msra.mxu1 %v2629_v34  ;;  %2457 = vmatprep.subr.bf16.mxu0 %v2630_v35 }
 0x225   :  { %2479 = vmatprep.subr.bf16.mxu1 %v2631_v45 }
 0x227   :  { %2458 = vmatpush3.bf16.msra.mxu0 %v2632_v47 }
 0x228   :  { %2480 = vmatpush3.bf16.msra.mxu1 %v2633_v48  ;;  %2459 = vmatprep.subr.bf16.mxu0 %v2634_v39 }
 0x229   :  { %2481 = vmatprep.subr.bf16.mxu1 %v2635_v40 }
 0x22b   :  { %2460 = vmatpush3.bf16.msra.mxu0 %v2636_v51 }
 0x22c   :  { %2482 = vmatpush3.bf16.msra.mxu1 %v2637_v52  ;;  %2461 = vmatprep.subr.bf16.mxu0 %v2638_v53 }
 0x22d   :  { %2483 = vmatprep.subr.bf16.mxu1 %v2639_v54 }
 0x22f   :  { %2462 = vmatpush3.bf16.msra.mxu0 %v2640_v55 }
 0x230   :  { %2484 = vmatpush3.bf16.msra.mxu1 %v2641_v60 }
 0x232   :  { %2105 = vmatmul.mubr.bf16.vlgmr.msra.gmra.mrb[28].mxu0 %v797_v57 }
 0x233   :  { %2145 = vmatmul.mubr.bf16.vlgmr.msra.gmra.mrb[28].mxu1 %v799_v63 }
 0x2a5   :  { %v2331_v0 = vpop.f32.mrb[16].mxu0  ;;  %v2353_v1 = vpop.f32.mrb[16].mxu1 }
 0x2a6   :  { %v2332_v2 = vpop.f32.mrb[17].mxu0  ;;  %v2354_v5 = vpop.f32.mrb[17].mxu1 }
 0x2a7   :  { %v2333_v3 = vadd.f32 %v2332_v2, %v2331_v0  ;;  %v2355_v4 = vadd.f32 %v2354_v5, %v2353_v1  ;;  %v2334_v9 = vpop.f32.mrb[18].mxu0  ;;  %v2356_v10 = vpop.f32.mrb[18].mxu1 }
 0x2a8   :  { %v2335_v6 = vpop.f32.mrb[19].mxu0  ;;  %v2357_v11 = vpop.f32.mrb[19].mxu1 }
 0x2a9   :  { %v1867_v12 = vadd.f32 %v2333_v3, %v2186_v46 }
 0x2ab   :  { %v1907_v56 = vadd.f32 %v2355_v4, %v1867_v12 }
 0x2c5   :  { %v2375_v15 = vpop.f32.mrb[20].mxu0  ;;  %v2397_v16 = vpop.f32.mrb[20].mxu1 }
 0x2c6   :  { %v2376_v17 = vpop.f32.mrb[21].mxu0  ;;  %v2398_v38 = vpop.f32.mrb[21].mxu1 }
 0x2c7   :  { %v2377_v18 = vadd.f32 %v2376_v17, %v2375_v15  ;;  %v2399_v19 = vadd.f32 %v2398_v38, %v2397_v16  ;;  %v2378_v58 = vpop.f32.mrb[22].mxu0  ;;  %v2400_v43 = vpop.f32.mrb[22].mxu1 }
 0x2c8   :  { %v2379_v37 = vpop.f32.mrb[23].mxu0  ;;  %v2401_v62 = vpop.f32.mrb[23].mxu1 }
 0x2c9   :  { %v1947_v20 = vadd.f32 %v2377_v18, %v1907_v56 }
 0x2cb   :  { %v1987_v21 = vadd.f32 %v2399_v19, %v1947_v20 }
 0x2e5   :  { %v2419_v22 = vpop.f32.mrb[24].mxu0 }
 0x2e6   :  { %v2441_v36 = vpop.f32.mrb[24].mxu1  ;;  %v2420_v41 = vpop.f32.mrb[25].mxu0 }
 0x2e7   :  { %v2421_v7 = vadd.f32 %v2420_v41, %v2419_v22  ;;  %v2442_v8 = vpop.f32.mrb[25].mxu1  ;;  %v2422_v23 = vpop.f32.mrb[26].mxu0 }
 0x2e8   :  { %v2443_v49 = vadd.f32 %v2442_v8, %v2441_v36  ;;  %v2444_v24 = vpop.f32.mrb[26].mxu1  ;;  %v2423_v25 = vpop.f32.mrb[27].mxu0 }
 0x2e9   :  { %v2027_v50 = vadd.f32 %v2421_v7, %v1987_v21  ;;  %v2445_v26 = vpop.f32.mrb[27].mxu1 }
 0x2eb   :  { %v2067_v42 = vadd.f32 %v2443_v49, %v2027_v50 }
 0x305   :  { %v2463_v27 = vpop.f32.mrb[28].mxu0 }
 0x306   :  { %v2485_v28 = vpop.f32.mrb[28].mxu1  ;;  %v2464_v44 = vpop.f32.mrb[29].mxu0 }
 0x307   :  { %v2465_v29 = vadd.f32 %v2464_v44, %v2463_v27  ;;  %v2486_v30 = vpop.f32.mrb[29].mxu1  ;;  %v2466_v31 = vpop.f32.mrb[30].mxu0 }
 0x308   :  { %v2487_v13 = vadd.f32 %v2486_v30, %v2485_v28  ;;  %v2488_v14 = vpop.f32.mrb[30].mxu1  ;;  %v2467_v32 = vpop.f32.mrb[31].mxu0 }
 0x309   :  { %v2107_v33 = vadd.f32 %v2465_v29, %v2067_v42  ;;  %v2489_v34 = vpop.f32.mrb[31].mxu1 }
 0x30b   :  { %v2147_v35 = vadd.f32 %v2487_v13, %v2107_v33 }
 0x30d   :  { %2152 = vst [vmem:[#allocation10] sm:$0xff] %v2147_v35 }
 0x30e   :  { %2741 = shalt.err (!%p2738_p8)
}
 0x30f   :  { %s2742_s22 = scalar_lea.hbm %s3030_s5, 128 }
 0x310   :  { %p2743_p9 = scmp.ne.s32.totalorder %s3030_s5, %s2742_s22  ;;  %p2746_p10 = scmp.lt.u32.totalorder %s2742_s22, %s3030_s5 }
 0x312   :  { %p2748_p11 = pnand %p2746_p10, %p2743_p9 }
 0x314   :  { %2751 = shalt.err (!%p2748_p11)
}
 0x315   :  { %2162 = dma.vmem_to_hbm [thread:$0]  %s2160_s17, 128, %s3030_s5, [#allocation4]  }
 0x316   :  { %2758 = dma.done.wait [#allocation4], 128  }
 0x317   :  { %2759 = vsyncadd [#allocation4], 4294967168 }
 0x318   :  { %2166 = vsyncpa [#allocation3], 1 }
 0x319   :  { %2167 = vsyncpa [#allocation6], 1 }
 0x31a   :  { %2168 = vsyncpa [#allocation9], 1 }
 0x31b   :  { %2169 = vsyncpa [#allocation4], 1 }

</bundles_post_ra>
